<compile_context>
chip_gen: v6e
topology: v6e:2x2x1
jax: 0.10.0
libtpu: 0.0.40
codegen_flags: <defaults>
</compile_context>

<pallas_src>
import functools

import jax
import jax.numpy as jnp
from jax.experimental import pallas as pl
from jax.experimental.pallas import tpu as pltpu


def _round_up(v, m):
    return (v + m - 1) // m * m


def _vmem_limit_bytes():
    """Per-kernel VMEM limit: ~65% of physical capacity, conservatively assuming
    v7x's 64 MiB per-core VMEM when the capacity cannot be queried."""
    cap = None
    try:
        info_fn = getattr(pltpu, "get_tpu_info", None)
        if info_fn is not None:
            cap = int(info_fn().vmem_capacity_bytes)
    except Exception:
        cap = None
    if not cap:
        cap = 64 * 1024 * 1024
    return max(16 * 1024 * 1024, min(int(cap * 0.65), 96 * 1024 * 1024))


def _pick_tile_e(num_edges, feat_dim, x_itemsize, w_itemsize, budget_bytes,
                 fused, tile_cap=8192):
    """Largest edge tile that fits the VMEM budget (lane/sublane padding included)."""
    sub = 8 * max(1, 4 // max(1, x_itemsize))        # sublane packing multiple
    lanes_d = _round_up(max(feat_dim, 1), 128)        # feature dim padded to 128 lanes
    lanes_w = 128                                     # (TE, 1) blocks pad to 128 lanes
    if fused:
        # xs/xd gather scratch (single-buffered, f32) + double-buffered weight block.
        per_row = 2 * lanes_d * x_itemsize + 2 * lanes_w * w_itemsize
    else:
        # double-buffered xs/xd streamed blocks + double-buffered weight block.
        per_row = 2 * 2 * lanes_d * x_itemsize + 2 * lanes_w * w_itemsize
    te = max(sub, budget_bytes // per_row)
    te = min(te, tile_cap, _round_up(max(num_edges, 1), sub))
    return max(sub, int(te) // sub * sub)


def _tile_loss(xs, xd, w, thrd, row_valid):
    """Masked per-tile partial (sum, count) of relu(thrd - cos_sim).

    xs, xd    : (TE, D) float32   gathered feature rows
    w         : (TE, 1)           edge weights (native dtype)
    thrd      : scalar float32
    row_valid : (TE, 1) bool      True for rows that correspond to real edges
    """
    eps = jnp.float32(1e-8)
    eps2 = eps * eps
    dot = jnp.sum(xs * xd, axis=-1, keepdims=True)               # (TE, 1)
    ns2 = jnp.sum(xs * xs, axis=-1, keepdims=True)                # (TE, 1)
    nd2 = jnp.sum(xd * xd, axis=-1, keepdims=True)                # (TE, 1)
    # cos = dot / (max(||xs||,eps) * max(||xd||,eps))  -> single EUP rsqrt
    # (per-norm eps clamp: matches recent PyTorch F.cosine_similarity)
    inv = jax.lax.rsqrt(jnp.maximum(ns2, eps2) * jnp.maximum(nd2, eps2))
    val = jnp.maximum(thrd - dot * inv, 0.0)                      # relu(thrd - sim)
    keep = jnp.logical_and(row_valid, w > 0)
    # jnp.where (select) guards against NaN/Inf garbage in out-of-range rows of a
    # partial last block leaking into the sum.
    vsum = jnp.sum(jnp.where(keep, val, 0.0), axis=0, keepdims=True)   # (1, 1)
    csum = jnp.sum(keep.astype(jnp.float32), axis=0, keepdims=True)    # (1, 1)
    return vsum, csum


def _homo_loss_gather_kernel(src_ref, dst_ref, thrd_ref, x_ref, w_ref,
                             sums_ref, cnts_ref, xs_buf, xd_buf, *, num_edges):
    """Fused-gather kernel: x is resident in VMEM, src/dst indices are in SMEM.

    src_ref/dst_ref : SMEM (E_pad,) i32   scalar-prefetched edge endpoints
    thrd_ref        : SMEM (1,) f32       threshold
    x_ref           : VMEM (N, D) f32     node features (whole array, resident)
    w_ref           : VMEM (TE, 1)        edge-weight tile (native dtype)
    sums_ref/cnts_ref : VMEM (1, 1) f32   resident output accumulators
    xs_buf/xd_buf   : VMEM (TE, D) f32    gather scratch
    """
    i = pl.program_id(0)
    tile_e = xs_buf.shape[0]
    base = i * tile_e

    @pl.when(i == 0)
    def _init():
        sums_ref[...] = jnp.zeros_like(sums_ref)
        cnts_ref[...] = jnp.zeros_like(cnts_ref)

    def gather_row(r, carry):
        s = src_ref[base + r]
        t = dst_ref[base + r]
        xs_buf[pl.ds(r, 1), :] = x_ref[pl.ds(s, 1), :]
        xd_buf[pl.ds(r, 1), :] = x_ref[pl.ds(t, 1), :]
        return carry

    jax.lax.fori_loop(0, tile_e, gather_row, 0)

    row = base + jax.lax.broadcasted_iota(jnp.int32, (tile_e, 1), 0)
    vsum, csum = _tile_loss(xs_buf[...], xd_buf[...], w_ref[...],
                            thrd_ref[0], row < num_edges)
    sums_ref[...] += vsum
    cnts_ref[...] += csum


def _homo_loss_stream_kernel(thrd_ref, xs_ref, xd_ref, w_ref,
                             sums_ref, cnts_ref, *, num_edges):
    """Streaming fallback: pre-gathered (E, D) rows are tiled through VMEM."""
    i = pl.program_id(0)
    tile_e = xs_ref.shape[0]

    @pl.when(i == 0)
    def _init():
        sums_ref[...] = jnp.zeros_like(sums_ref)
        cnts_ref[...] = jnp.zeros_like(cnts_ref)

    row = i * tile_e + jax.lax.broadcasted_iota(jnp.int32, (tile_e, 1), 0)
    vsum, csum = _tile_loss(xs_ref[...].astype(jnp.float32),
                            xd_ref[...].astype(jnp.float32),
                            w_ref[...], thrd_ref[0], row < num_edges)
    sums_ref[...] += vsum
    cnts_ref[...] += csum


@functools.partial(jax.jit, static_argnames=("tile_e", "fused"))
def homo_loss(trigger_edge_index, trigger_edge_weights, x, thrd, *,
              tile_e=None, fused=None):
    """HomoLoss forward.  `fused=None` auto-selects the in-kernel gather path."""
    src = trigger_edge_index[0]
    dst = trigger_edge_index[1]
    e = int(src.shape[0])
    n, d = x.shape
    if e == 0:
        return jnp.float32(jnp.nan)     # mean over an empty selection (matches torch)

    w2d = trigger_edge_weights.reshape(-1, 1)     # native dtype, no f32 round trip
    thrd_arr = jnp.asarray(thrd, dtype=jnp.float32).reshape(1)

    vmem_limit = _vmem_limit_bytes()
    x_item = jnp.dtype(x.dtype).itemsize
    w_item = jnp.dtype(w2d.dtype).itemsize
    lanes_d = _round_up(d, 128)
    slack = 4 * 1024 * 1024

    # Fused gather keeps x resident in VMEM as f32 (simple 32-bit dynamic row copies).
    x_res_bytes = _round_up(n, 8) * lanes_d * 4
    if fused is None:
        fused = (x_res_bytes <= min(16 * 1024 * 1024, vmem_limit // 3)
                 and e <= 65536)        # src/dst index tables must also fit in SMEM

    out_shapes = (jax.ShapeDtypeStruct((1, 1), jnp.float32),
                  jax.ShapeDtypeStruct((1, 1), jnp.float32))
    cparams = pltpu.CompilerParams(dimension_semantics=("arbitrary",),
                                   vmem_limit_bytes=vmem_limit)

    if fused:
        budget = max(1, vmem_limit - x_res_bytes - slack)
        if tile_e is None:
            tile_e = _pick_tile_e(e, d, 4, w_item, budget, fused=True)
        n_tiles = pl.cdiv(e, tile_e)
        e_pad = n_tiles * tile_e
        # Padded index entries point at row 0 (valid memory); masked out via row < E.
        src_pad = jnp.pad(src.astype(jnp.int32), (0, e_pad - e))
        dst_pad = jnp.pad(dst.astype(jnp.int32), (0, e_pad - e))
        x_f32 = x.astype(jnp.float32)
        # TODO(synk): keep x in native dtype in VMEM (halves residency for bf16) once
        # packed-dtype dynamic-row copies are wired into the gather loop.
        kernel = functools.partial(_homo_loss_gather_kernel, num_edges=e)
        sums, cnts = pl.pallas_call(
            kernel,
            out_shape=out_shapes,
            grid_spec=pltpu.PrefetchScalarGridSpec(
                num_scalar_prefetch=2,
                grid=(n_tiles,),
                in_specs=[
                    pl.BlockSpec(memory_space=pltpu.MemorySpace.SMEM),   # thrd scalar
                    pl.BlockSpec(memory_space=pltpu.MemorySpace.VMEM),   # x (resident)
                    pl.BlockSpec((tile_e, 1), lambda i, s_r, d_r: (i, 0)),  # weights
                ],
                out_specs=[
                    pl.BlockSpec((1, 1), lambda i, s_r, d_r: (0, 0)),
                    pl.BlockSpec((1, 1), lambda i, s_r, d_r: (0, 0)),
                ],
                scratch_shapes=[
                    pltpu.VMEM((tile_e, d), jnp.float32),   # gathered x[src] tile
                    pltpu.VMEM((tile_e, d), jnp.float32),   # gathered x[dst] tile
                ],
            ),
            compiler_params=cparams,
        )(src_pad, dst_pad, thrd_arr, x_f32, w2d)
    else:
        # Streaming fallback: wrapper-side gather, native-dtype tiles streamed to VMEM.
        # TODO(synk): for huge x, replace the XLA gather with a manual double-buffered
        # per-row make_async_copy gather from x kept in memory_space=pl.ANY.
        xs = x[src]
        xd = x[dst]
        budget = max(1, vmem_limit - slack)
        if tile_e is None:
            tile_e = _pick_tile_e(e, d, x_item, w_item, budget, fused=False)
        n_tiles = pl.cdiv(e, tile_e)
        kernel = functools.partial(_homo_loss_stream_kernel, num_edges=e)
        sums, cnts = pl.pallas_call(
            kernel,
            out_shape=out_shapes,
            grid_spec=pltpu.PrefetchScalarGridSpec(
                num_scalar_prefetch=0,
                grid=(n_tiles,),
                in_specs=[
                    pl.BlockSpec(memory_space=pltpu.MemorySpace.SMEM),   # thrd scalar
                    pl.BlockSpec((tile_e, d), lambda i: (i, 0)),         # x[src] tile
                    pl.BlockSpec((tile_e, d), lambda i: (i, 0)),         # x[dst] tile
                    pl.BlockSpec((tile_e, 1), lambda i: (i, 0)),         # weights
                ],
                out_specs=[
                    pl.BlockSpec((1, 1), lambda i: (0, 0)),
                    pl.BlockSpec((1, 1), lambda i: (0, 0)),
                ],
            ),
            compiler_params=cparams,
        )(thrd_arr, xs, xd, w2d)

    # Count accumulates in f32: exact up to 2^24 (~16.7M) valid edges.
    return (sums[0, 0] / cnts[0, 0]).astype(jnp.float32)


def _reference(trigger_edge_index, trigger_edge_weights, x, thrd):
    """Pure-JAX reference of the PyTorch forward (masked-mean formulation)."""
    xs = x[trigger_edge_index[0]].astype(jnp.float32)
    xd = x[trigger_edge_index[1]].astype(jnp.float32)
    eps = 1e-8
    dot = jnp.sum(xs * xd, axis=-1)
    ns = jnp.sqrt(jnp.sum(xs * xs, axis=-1))
    nd = jnp.sqrt(jnp.sum(xd * xd, axis=-1))
    sim = dot / (jnp.maximum(ns, eps) * jnp.maximum(nd, eps))
    val = jnp.maximum(jnp.float32(thrd) - sim, 0.0)
    mask = (trigger_edge_weights > 0.0).astype(jnp.float32)
    return jnp.sum(val * mask) / jnp.sum(mask)


if __name__ == "__main__":
    key = jax.random.PRNGKey(0)
    thrd = 0.5

    def make_case(k, num_nodes, feat_dim, num_edges, dtype):
        k1, k2, k3, k4 = jax.random.split(k, 4)
        x = jax.random.normal(k1, (num_nodes, feat_dim), dtype=jnp.float32).astype(dtype)
        src = jax.random.randint(k2, (num_edges,), 0, num_nodes)
        dst = jax.random.randint(k3, (num_edges,), 0, num_nodes)
        ei = jnp.stack([src, dst], axis=0)                          # (2, E)
        # weights in [-0.5, 1.0] so some edges are filtered out (weight <= 0)
        ew = jax.random.uniform(k4, (num_edges,), minval=-0.5, maxval=1.0,
                                dtype=jnp.float32)
        return ei, ew, x

    ka, kb, kc, kd = jax.random.split(key, 4)

    # Case 1: tiny single-tile fused-gather case, edge count not a multiple of 8.
    ei, ew, x = make_case(ka, 10, 32, 13, jnp.float32)
    out = jax.block_until_ready(homo_loss(ei, ew, x, thrd))
    ref = _reference(ei, ew, x, thrd)
    assert jnp.allclose(out, ref, rtol=1e-4, atol=1e-5), (out, ref)

    # Case 2: multi-tile fused-gather grid with a partial tail tile (11 tiles of 64).
    ei, ew, x = make_case(kb, 50, 32, 700, jnp.float32)
    out = jax.block_until_ready(homo_loss(ei, ew, x, thrd, tile_e=64))
    ref = _reference(ei, ew, x, thrd)
    assert jnp.allclose(out, ref, rtol=1e-4, atol=1e-5), (out, ref)

    # Case 3: bf16 features through the fused-gather path.
    ei, ew, x = make_case(kc, 24, 32, 37, jnp.bfloat16)
    out = jax.block_until_ready(homo_loss(ei, ew, x, thrd))
    ref = _reference(ei, ew, x, thrd)
    assert jnp.allclose(out, ref, rtol=1e-4, atol=1e-5), (out, ref)

    # Case 4: forced streaming fallback path, feature dim not a multiple of 128.
    ei, ew, x = make_case(kd, 40, 160, 300, jnp.float32)
    out = jax.block_until_ready(homo_loss(ei, ew, x, thrd, tile_e=64, fused=False))
    ref = _reference(ei, ew, x, thrd)
    assert jnp.allclose(out, ref, rtol=1e-4, atol=1e-5), (out, ref)

    print("KERNEL_OK")
</pallas_src>

<mosaic_0001>
module attributes {stable_mosaic.version = 11 : i64} {
  func.func @_homo_loss_gather_kernel(%arg0: i32, %arg1: memref<16xi32, #tpu.memory_space<smem>>, %arg2: memref<16xi32, #tpu.memory_space<smem>>, %arg3: memref<1xf32, #tpu.memory_space<smem>>, %arg4: memref<10x32xf32, #tpu.memory_space<vmem>>, %arg5: memref<16x1xf32, #tpu.memory_space<vmem>>, %arg6: memref<1x1xf32, #tpu.memory_space<vmem>>, %arg7: memref<1x1xf32, #tpu.memory_space<vmem>>, %arg8: memref<16x32xf32, #tpu.memory_space<vmem>>, %arg9: memref<16x32xf32, #tpu.memory_space<vmem>>) attributes {dimension_semantics = [#tpu.dimension_semantics<arbitrary>], iteration_bounds = array<i64: 1>, scalar_prefetch = 2 : i64, scratch_operands = 2 : i64, tpu.core_type = #tpu.core_type<tc>, window_params = [{transform_indices = @transform_0, window_bounds = array<i64: 1>}, {pipeline_mode = #tpu.pipeline_mode<synchronous>, transform_indices = @transform_1, window_bounds = array<i64: 10, 32>}, {transform_indices = @transform_2, window_bounds = array<i64: 16, 1>}, {pipeline_mode = #tpu.pipeline_mode<synchronous>, transform_indices = @transform_3, window_bounds = array<i64: 1, 1>}, {pipeline_mode = #tpu.pipeline_mode<synchronous>, transform_indices = @transform_4, window_bounds = array<i64: 1, 1>}]} {
    %c16_i32 = arith.constant 16 : i32
    %0 = arith.muli %arg0, %c16_i32 : i32
    %c0_i32 = arith.constant 0 : i32
    %1 = arith.cmpi eq, %arg0, %c0_i32 : i32
    %2 = arith.extui %1 : i1 to i32
    %c0_i32_0 = arith.constant 0 : i32
    %3 = arith.cmpi ne, %2, %c0_i32_0 : i32
    scf.if %3 {
      %cst_27 = arith.constant 0.000000e+00 : f32
      %52 = vector.broadcast %cst_27 : f32 to vector<1x1xf32>
      %c0_28 = arith.constant 0 : index
      %c0_29 = arith.constant 0 : index
      %53 = vector.load %arg6[%c0_28, %c0_29] : memref<1x1xf32, #tpu.memory_space<vmem>>, vector<1x1xf32>
      tpu.vector_store %arg6[%c0_28, %c0_29], %52 {strides = array<i32>} : memref<1x1xf32, #tpu.memory_space<vmem>>, vector<1x1xf32>,
      %cst_30 = arith.constant 0.000000e+00 : f32
      %54 = vector.broadcast %cst_30 : f32 to vector<1x1xf32>
      %c0_31 = arith.constant 0 : index
      %c0_32 = arith.constant 0 : index
      %55 = vector.load %arg7[%c0_31, %c0_32] : memref<1x1xf32, #tpu.memory_space<vmem>>, vector<1x1xf32>
      tpu.vector_store %arg7[%c0_31, %c0_32], %54 {strides = array<i32>} : memref<1x1xf32, #tpu.memory_space<vmem>>, vector<1x1xf32>,
    } else {
    }
    %c0_i32_1 = arith.constant 0 : i32
    %c16_i32_2 = arith.constant 16 : i32
    %4 = arith.addi %c0_i32_1, %c16_i32_2 : i32
    %c1_i32 = arith.constant 1 : i32
    scf.for %arg10 = %c0_i32_1 to %4 step %c1_i32  : i32 {
      %52 = arith.addi %0, %arg10 : i32
      %53 = arith.index_cast %52 : i32 to index
      %54 = memref.load %arg1[%53] : memref<16xi32, #tpu.memory_space<smem>>
      %55 = arith.addi %0, %arg10 : i32
      %56 = arith.index_cast %55 : i32 to index
      %57 = memref.load %arg2[%56] : memref<16xi32, #tpu.memory_space<smem>>
      %58 = arith.index_cast %54 : i32 to index
      %c0_27 = arith.constant 0 : index
      %59 = vector.load %arg4[%58, %c0_27] : memref<10x32xf32, #tpu.memory_space<vmem>>, vector<1x32xf32>
      %60 = arith.index_cast %arg10 : i32 to index
      %c0_28 = arith.constant 0 : index
      %61 = vector.load %arg8[%60, %c0_28] : memref<16x32xf32, #tpu.memory_space<vmem>>, vector<1x32xf32>
      tpu.vector_store %arg8[%60, %c0_28], %59 {strides = array<i32>} : memref<16x32xf32, #tpu.memory_space<vmem>>, vector<1x32xf32>,
      %62 = arith.index_cast %57 : i32 to index
      %c0_29 = arith.constant 0 : index
      %63 = vector.load %arg4[%62, %c0_29] : memref<10x32xf32, #tpu.memory_space<vmem>>, vector<1x32xf32>
      %64 = arith.index_cast %arg10 : i32 to index
      %c0_30 = arith.constant 0 : index
      %65 = vector.load %arg9[%64, %c0_30] : memref<16x32xf32, #tpu.memory_space<vmem>>, vector<1x32xf32>
      tpu.vector_store %arg9[%64, %c0_30], %63 {strides = array<i32>} : memref<16x32xf32, #tpu.memory_space<vmem>>, vector<1x32xf32>,
    }
    %c16_i32_3 = arith.constant 16 : i32
    %5 = tpu.iota {dimensions = array<i32: 0>} : vector<16x1xi32>
    %6 = vector.broadcast %0 : i32 to vector<16x1xi32>
    %7 = arith.addi %6, %5 : vector<16x1xi32>
    %c0 = arith.constant 0 : index
    %c0_4 = arith.constant 0 : index
    %8 = vector.load %arg8[%c0, %c0_4] : memref<16x32xf32, #tpu.memory_space<vmem>>, vector<16x32xf32>
    %c0_5 = arith.constant 0 : index
    %c0_6 = arith.constant 0 : index
    %9 = vector.load %arg9[%c0_5, %c0_6] : memref<16x32xf32, #tpu.memory_space<vmem>>, vector<16x32xf32>
    %c0_7 = arith.constant 0 : index
    %c0_8 = arith.constant 0 : index
    %10 = vector.load %arg5[%c0_7, %c0_8] : memref<16x1xf32, #tpu.memory_space<vmem>>, vector<16x1xf32>
    %c0_9 = arith.constant 0 : index
    %11 = memref.load %arg3[%c0_9] : memref<1xf32, #tpu.memory_space<smem>>
    %c13_i32 = arith.constant 13 : i32
    %12 = vector.broadcast %c13_i32 : i32 to vector<16x1xi32>
    %13 = arith.cmpi slt, %7, %12 : vector<16x1xi32>
    %cst = arith.constant 9.99999993E-9 : f32
    %cst_10 = arith.constant 9.99999993E-9 : f32
    %14 = arith.mulf %cst, %cst_10 : f32
    %15 = arith.mulf %8, %9 : vector<16x32xf32>
    %cst_11 = arith.constant dense<0.000000e+00> : vector<16xf32>
    %16 = vector.multi_reduction <add>, %15, %cst_11 [1] : vector<16x32xf32> to vector<16xf32>
    %17 = vector.shape_cast %16 : vector<16xf32> to vector<16x1xf32>
    %18 = arith.mulf %8, %8 : vector<16x32xf32>
    %cst_12 = arith.constant dense<0.000000e+00> : vector<16xf32>
    %19 = vector.multi_reduction <add>, %18, %cst_12 [1] : vector<16x32xf32> to vector<16xf32>
    %20 = vector.shape_cast %19 : vector<16xf32> to vector<16x1xf32>
    %21 = arith.mulf %9, %9 : vector<16x32xf32>
    %cst_13 = arith.constant dense<0.000000e+00> : vector<16xf32>
    %22 = vector.multi_reduction <add>, %21, %cst_13 [1] : vector<16x32xf32> to vector<16xf32>
    %23 = vector.shape_cast %22 : vector<16xf32> to vector<16x1xf32>
    %24 = vector.broadcast %14 : f32 to vector<16x1xf32>
    %25 = arith.maximumf %20, %24 : vector<16x1xf32>
    %26 = vector.broadcast %14 : f32 to vector<16x1xf32>
    %27 = arith.maximumf %23, %26 : vector<16x1xf32>
    %28 = arith.mulf %25, %27 : vector<16x1xf32>
    %29 = math.rsqrt %28 : vector<16x1xf32>
    %30 = arith.mulf %17, %29 : vector<16x1xf32>
    %31 = vector.broadcast %11 : f32 to vector<16x1xf32>
    %32 = arith.subf %31, %30 : vector<16x1xf32>
    %cst_14 = arith.constant 0.000000e+00 : f32
    %33 = vector.broadcast %cst_14 : f32 to vector<16x1xf32>
    %34 = arith.maximumf %32, %33 : vector<16x1xf32>
    %cst_15 = arith.constant 0.000000e+00 : f32
    %35 = vector.broadcast %cst_15 : f32 to vector<16x1xf32>
    %36 = arith.cmpf ogt, %10, %35 : vector<16x1xf32>
    %37 = arith.andi %13, %36 : vector<16x1xi1>
    %cst_16 = arith.constant 0.000000e+00 : f32
    %38 = vector.broadcast %cst_16 : f32 to vector<16x1xf32>
    %39 = arith.select %37, %34, %38 : vector<16x1xi1>, vector<16x1xf32>
    %cst_17 = arith.constant dense<0.000000e+00> : vector<1xf32>
    %40 = vector.multi_reduction <add>, %39, %cst_17 [0] : vector<16x1xf32> to vector<1xf32>
    %41 = vector.shape_cast %40 : vector<1xf32> to vector<1x1xf32>
    %42 = arith.extui %37 : vector<16x1xi1> to vector<16x1xi32>
    %43 = arith.sitofp %42 : vector<16x1xi32> to vector<16x1xf32>
    %cst_18 = arith.constant dense<0.000000e+00> : vector<1xf32>
    %44 = vector.multi_reduction <add>, %43, %cst_18 [0] : vector<16x1xf32> to vector<1xf32>
    %45 = vector.shape_cast %44 : vector<1xf32> to vector<1x1xf32>
    %c0_19 = arith.constant 0 : index
    %c0_20 = arith.constant 0 : index
    %46 = vector.load %arg6[%c0_19, %c0_20] : memref<1x1xf32, #tpu.memory_space<vmem>>, vector<1x1xf32>
    %47 = arith.addf %46, %41 : vector<1x1xf32>
    %c0_21 = arith.constant 0 : index
    %c0_22 = arith.constant 0 : index
    %48 = vector.load %arg6[%c0_21, %c0_22] : memref<1x1xf32, #tpu.memory_space<vmem>>, vector<1x1xf32>
    tpu.vector_store %arg6[%c0_21, %c0_22], %47 {strides = array<i32>} : memref<1x1xf32, #tpu.memory_space<vmem>>, vector<1x1xf32>,
    %c0_23 = arith.constant 0 : index
    %c0_24 = arith.constant 0 : index
    %49 = vector.load %arg7[%c0_23, %c0_24] : memref<1x1xf32, #tpu.memory_space<vmem>>, vector<1x1xf32>
    %50 = arith.addf %49, %45 : vector<1x1xf32>
    %c0_25 = arith.constant 0 : index
    %c0_26 = arith.constant 0 : index
    %51 = vector.load %arg7[%c0_25, %c0_26] : memref<1x1xf32, #tpu.memory_space<vmem>>, vector<1x1xf32>
    tpu.vector_store %arg7[%c0_25, %c0_26], %50 {strides = array<i32>} : memref<1x1xf32, #tpu.memory_space<vmem>>, vector<1x1xf32>,
    return
  }
  func.func @transform_0(%arg0: i32, %arg1: memref<16xi32, #tpu.memory_space<smem>>, %arg2: memref<16xi32, #tpu.memory_space<smem>>) -> i32 {
    %c0_i32 = arith.constant 0 : i32
    %c0_i32_0 = arith.constant 0 : i32
    return %c0_i32 : i32
  }
  func.func @transform_1(%arg0: i32, %arg1: memref<16xi32, #tpu.memory_space<smem>>, %arg2: memref<16xi32, #tpu.memory_space<smem>>) -> (i32, i32) {
    %c0_i32 = arith.constant 0 : i32
    %c0_i32_0 = arith.constant 0 : i32
    %c0_i32_1 = arith.constant 0 : i32
    return %c0_i32, %c0_i32_0 : i32, i32
  }
  func.func @transform_2(%arg0: i32, %arg1: memref<16xi32, #tpu.memory_space<smem>>, %arg2: memref<16xi32, #tpu.memory_space<smem>>) -> (i32, i32) {
    %c0_i32 = arith.constant 0 : i32
    %c0_i32_0 = arith.constant 0 : i32
    return %arg0, %c0_i32 : i32, i32
  }
  func.func @transform_3(%arg0: i32, %arg1: memref<16xi32, #tpu.memory_space<smem>>, %arg2: memref<16xi32, #tpu.memory_space<smem>>) -> (i32, i32) {
    %c0_i32 = arith.constant 0 : i32
    %c0_i32_0 = arith.constant 0 : i32
    %c0_i32_1 = arith.constant 0 : i32
    return %c0_i32, %c0_i32_0 : i32, i32
  }
  func.func @transform_4(%arg0: i32, %arg1: memref<16xi32, #tpu.memory_space<smem>>, %arg2: memref<16xi32, #tpu.memory_space<smem>>) -> (i32, i32) {
    %c0_i32 = arith.constant 0 : i32
    %c0_i32_0 = arith.constant 0 : i32
    %c0_i32_1 = arith.constant 0 : i32
    return %c0_i32, %c0_i32_0 : i32, i32
  }
}

</mosaic_0001>

<bundles_post_ra>
// kernel: homo_loss.1
= control target key start
LH: loop header
LB: loop body
LE: loop exit
PB: predicated region body
PF: predicated region fallthrough
CT: control target
= control target key end

     0   :  { %s373_s0 = inlined_call_operand.vmem [shape: s32[16], index: 0, kind: input, shape index: {}]   ;;  %s374_s3 = inlined_call_operand.vmem [shape: f32[10,32], index: 3, kind: input, shape index: {}]   ;;  %s375_s4 = inlined_call_operand.vmem [shape: f32[13,1], index: 4, kind: input, shape index: {}]   ;;  %s376_s5 = inlined_call_operand.hbm [shape: f32[1,1], index: 5, kind: output, shape index: {0}]   ;;  %s377_s6 = inlined_call_operand.hbm [shape: f32[1,1], index: 6, kind: output, shape index: {1}]   ;;  %s378_s1 = inlined_call_operand.vmem [shape: s32[16], index: 1, kind: input, shape index: {}]   ;;  %s379_s2 = inlined_call_operand.<no memory space> [shape: f32[1], index: 2, kind: input, shape index: {}]  }
   0x1   :  { %s12_s23 = sshll.u32 %s373_s0, 4  ;;  %s16_s26 = sshll.u32 %s378_s1, 4  ;;  %s13_s23 = int_to_ptr.vmem [resolvable:$true] %s12_s23  ;;  %s17_s26 = int_to_ptr.vmem [resolvable:$true] %s16_s26 }
   0x2   :  { %s204_s27 = scalar_lea.vmem %s13_s23, 16  ;;  %p209_p1 = scmp.lt.s32.totalorder %s13_s23, %s13_s23 }
   0x3   :  { %p205_p0 = scmp.ne.s32.totalorder %s13_s23, %s204_s27  ;;  %p210_p2 = scmp.lt.s32.totalorder %s204_s27, %s204_s27 }
   0x5   :  { %p211_p3 = por %p210_p2, %p209_p1 }
   0x7   :  { %p212_p4 = pnand %p211_p3, %p205_p0 }
   0x9   :  { %215 = shalt.err (!%p212_p4)  }
   0xa   :  { %s282_s28 = smov [#allocation5]   ;;  %s216_s29 = scalar_lea.vmem %s17_s26, 16 }
   0xb   :  { %15 = dma.vmem_to_smem %s13_s23, 16, %s282_s28, [#allocation4] }
   0xc   :  { %p217_p5 = scmp.ne.s32.totalorder %s17_s26, %s216_s29  ;;  %p221_p6 = scmp.lt.s32.totalorder %s17_s26, %s17_s26 }
   0xd   :  { %p222_p7 = scmp.lt.s32.totalorder %s216_s29, %s216_s29 }
   0xf   :  { %p223_p8 = por %p222_p7, %p221_p6 }
  0x11   :  { %p224_p9 = pnand %p223_p8, %p217_p5 }
  0x13   :  { %227 = shalt.err (!%p224_p9)  }
  0x14   :  { %s283_s0 = smov [#allocation6]   ;;  %20 = sst [smem:[#allocation7]] %s379_s2 }
  0x15   :  { %19 = dma.vmem_to_smem %s17_s26, 16, %s283_s0, [#allocation4] }
  0x16   :  { %272 = dma.done.wait [#allocation4], 32 }
  0x17   :  { %273 = vsyncadd [#allocation4], 4294967264 }
  0x18   :  { %22 = sfence }
  0x19   :  { %23 = vsyncpa [#allocation9], 0 }
  0x1a   :  { %24 = vsyncpa [#allocation11], 0  ;;  %vm36_vm0 = vcmask 0   ;;  %v284_v0 = vmov 0.0   ;;  %s278_s7 = smov 0  }
  0x1b   :  { %37 = vst.msk [vmem:[#allocation8] sm:$0x1] %vm36_vm0, %v284_v0  ;;  %38 = vst.msk [vmem:[#allocation10] sm:$0x1] %vm36_vm0, %v284_v0 }
  0x1c LB: > { %s46_s8 = sld [smem:[#allocation5 + %s280_s7]]  ;;  %vm51_vm1 = vcmask 253952   ;;  %s50_s15 = scalar_lea.vmem [#allocation2], %s280_s7  ;;  %s280_s7 = sphi %s278_s7, %s44_s7  }
  0x1d   : > { %s47_s9 = sld [smem:[#allocation6 + %s280_s7]]  ;;  %s55_s16 = scalar_lea.vmem [#allocation3], %s280_s7 }
  0x1e   : > { %s44_s7 = sadd.s32 1, %s280_s7  }
  0x1f   : > { %p41_p10 = scmp.ge.s32.totalorder %s44_s7, 16  }
  0x20   :  { %vm74_vm2 = vcmask (%p41_p10), 261120   ;;  %v67_v19 = vld [vmem:[%s375_s4] sm:$0xff] (%p41_p10)  ;;  %v57_v20 = vlaneseq (%p41_p10)  ;;  %v68_v24 = vld [vmem:[%s375_s4 + $0x8] sm:$0xff] (%p41_p10)  ;;  %vm118_vm4 = vcmask (%p41_p10), 7168   ;;  %s285_s4 = smov (%p41_p10), [#allocation10]  }
  0x21   :  { %43 = sbr.rel (!%p41_p10) target bundleno = 28 (0x1c), region = 55  ;;  %vm112_vm3 = vcmp.gt.f32.partialorder (%p41_p10), %v67_v19, 0.0  ;;  %vm113_vm5 = vcmp.gt.f32.partialorder (%p41_p10), %v68_v24, 0.0  ;;  %s164_s20 = sshll.u32 (%p41_p10), %s285_s4, 4  ;;  %s165_s20 = int_to_ptr.vmem [resolvable:$true] %s164_s20 }
  0x22   : > { %s48_s11 = scalar_lea.vmem %s374_s3, %s46_s8  ;;  %v58_v21 = vshrl.u32 (%p41_p10), %v57_v20, 7  ;;  %v185_v22 = vsel (%p41_p10), %vm112_vm3, 1.0, %v284_v0  ;;  %v145_v36 = vld [vmem:[#allocation10] sm:$0x1] (%p41_p10)  ;;  %s228_s21 = scalar_lea.vmem (%p41_p10), %s165_s20, 16 }
  0x23   : > { %v49_v1 = vld [vmem:[%s48_s11] sm:$0x1]  ;;  %s53_s14 = scalar_lea.vmem %s374_s3, %s47_s9  ;;  %v132_v25 = vsel (%p41_p10), %vm118_vm4, %v185_v22, 0.0  ;;  %p229_p11 = scmp.ne.s32.totalorder (%p41_p10), %s165_s20, %s228_s21 }
  0x24   : > { %52 = vst.msk [vmem:[%s50_s15] sm:$0x1] %vm51_vm1, %v49_v1  ;;  %v54_v2 = vld [vmem:[%s53_s14] sm:$0x1]  ;;  %v59_v23 = vadd.s32 (%p41_p10), 8, %v58_v21  ;;  %s232_s22 = scalar_lea.vmem (%p41_p10), %s165_s20, 32  ;;  %p233_p12 = scmp.lt.s32.totalorder (%p41_p10), %s165_s20, %s165_s20 }
  0x25   : > { %56 = vst.msk [vmem:[%s55_s16] sm:$0x1] %vm51_vm1, %v54_v2  ;;  %p234_p13 = scmp.lt.s32.totalorder (%p41_p10), %s232_s22, %s228_s21 }
  0x26   :  { %vm71_vm6 = vcmp.lt.s32.totalorder %v59_v23, 13 }
  0x27   :  { %vm353_vm7 = vmand %vm71_vm6, %vm113_vm5  ;;  %p235_p0 = por %p234_p13, %p233_p12 }
  0x28   :  { %v186_v27 = vsel %vm353_vm7, 1.0, %v284_v0 }
  0x29   :  { %v133_v28 = vsel %vm118_vm4, %v186_v27, 0.0  ;;  %p236_p1 = pnand %p235_p0, %p229_p11 }
  0x2a   :  { %v134_v29 = vadd.f32 %v133_v28, %v132_v25 }
  0x2b   :  { %v63_v4 = vld [vmem:[#allocation2] sm:$0xff]  ;;  %v64_v9 = vld [vmem:[#allocation2 + $0x8] sm:$0xff] }
  0x2c   :  { %v65_v3 = vld [vmem:[#allocation3] sm:$0xff]  ;;  %v66_v5 = vld [vmem:[#allocation3 + $0x8] sm:$0xff]  ;;  %v81_v7 = vmul.f32 %v63_v4, %v63_v4  ;;  %v82_v10 = vmul.f32 %v64_v9, %v64_v9  ;;  %v135_v30 = vrot.slane %v134_v29, 4 }
  0x2d   :  { %v89_v6 = vmul.f32 %v65_v3, %v65_v3  ;;  %v90_v8 = vmul.f32 %v66_v5, %v66_v5  ;;  %v72_v15 = vmul.f32 %v65_v3, %v63_v4  ;;  %v73_v16 = vmul.f32 %v66_v5, %v64_v9 }
  0x2e   :  { %v83_v12 = vsel %vm74_vm2, %v81_v7, 0.0  ;;  %v86_v14 = vsel %vm74_vm2, %v82_v10, 0.0  ;;  %v136_v31 = vadd.f32 %v135_v30, %v134_v29 }
  0x2f   :  { %v91_v11 = vsel %vm74_vm2, %v89_v6, 0.0  ;;  %84 = vadd.xlane.f32.xlu0 %v83_v12  ;;  %v94_v13 = vsel %vm74_vm2, %v90_v8, 0.0  ;;  %v75_v17 = vsel %vm74_vm2, %v72_v15, 0.0  ;;  %v78_v18 = vsel %vm74_vm2, %v73_v16, 0.0 }
  0x30   :  { %92 = vadd.xlane.f32.xlu1 %v91_v11  ;;  %v137_v32 = vrot.slane %v136_v31, 2 }
  0x32   :  { %v138_v33 = vadd.f32 %v137_v32, %v136_v31 }
  0x33   :  { %87 = vadd.xlane.f32.xlu0 %v86_v14 }
  0x34   :  { %95 = vadd.xlane.f32.xlu1 %v94_v13  ;;  %v139_v34 = vrot.slane %v138_v33, 1 }
  0x36   :  { %v140_v35 = vadd.f32 %v139_v34, %v138_v33 }
  0x37   :  { %76 = vadd.xlane.f32.xlu0 %v75_v17 }
  0x38   :  { %79 = vadd.xlane.f32.xlu1 %v78_v18  ;;  %v146_v37 = vadd.f32 %v145_v36, %v140_v35 }
  0x3a   :  { %147 = vst.msk [vmem:[#allocation10] sm:$0x1] %vm36_vm0, %v146_v37 }
  0x3b   :  { %239 = shalt.err (!%p236_p1)
}
  0x3c   :  { %167 = dma.vmem_to_hbm [thread:$0]  %s165_s20, 16, %s377_s6, [#allocation11]   ;;  %v141_v5 = vld [vmem:[#allocation8] sm:$0x1] }
  0x3d   :  { %s69_s25 = sld [smem:[#allocation7]]  ;;  %s286_s6 = smov [#allocation8]  }
  0x3e   :  { %s154_s26 = sshll.u32 %s286_s6, 4  ;;  %s155_s26 = int_to_ptr.vmem [resolvable:$true] %s154_s26 }
  0x3f   :  { %s248_s27 = scalar_lea.vmem %s155_s26, 16  ;;  %s252_s28 = scalar_lea.vmem %s155_s26, 32 }
  0x40   :  { %p249_p2 = scmp.ne.s32.totalorder %s155_s26, %s248_s27  ;;  %p253_p3 = scmp.lt.s32.totalorder %s155_s26, %s155_s26 }
  0x41   :  { %p254_p4 = scmp.lt.s32.totalorder %s252_s28, %s248_s27 }
  0x43   :  { %v107_v50 = vstv %s69_s25  ;;  %p255_p5 = por %p254_p4, %p253_p3 }
  0x45   :  { %p256_p6 = pnand %p255_p5, %p249_p2 }
  0xb8   :  { %v85_v39 = vpop.xlane.xlu0 %84 }
  0xb9   :  { %v93_v38 = vpop.xlane.xlu1 %92  ;;  %v97_v41 = vmax.f32 %v85_v39, 1e-16 }
  0xba   :  { %v99_v40 = vmax.f32 %v93_v38, 1e-16 }
  0xbc   :  { %v101_v42 = vmul.f32 %v99_v40, %v97_v41  ;;  %v88_v44 = vpop.xlane.xlu0 %87 }
  0xbd   :  { %v96_v43 = vpop.xlane.xlu1 %95  ;;  %v98_v46 = vmax.f32 %v88_v44, 1e-16 }
  0xbe   :  { %200 = vrsqrt.f32 %v101_v42  ;;  %v100_v45 = vmax.f32 %v96_v43, 1e-16 }
  0xc0   :  { %v102_v47 = vmul.f32 %v100_v45, %v98_v46  ;;  %v77_v48 = vpop.xlane.xlu0 %76 }
  0xc1   :  { %v80_v52 = vpop.xlane.xlu1 %79 }
  0xc2   :  { %202 = vrsqrt.f32 %v102_v47 }
  0xcb   :  { %v201_v49 = vpop.eup %200 }
  0xcc   :  { %v105_v51 = vmul.f32 %v201_v49, %v77_v48 }
  0xce   :  { %v108_v53 = vsub.f32 %v107_v50, %v105_v51 }
  0xcf   :  { %v203_v54 = vpop.eup %202 }
  0xd0   :  { %v110_v55 = vmax.f32 %v108_v53, 0.0  ;;  %v106_v56 = vmul.f32 %v203_v54, %v80_v52 }
  0xd2   :  { %v109_v57 = vsub.f32 %v107_v50, %v106_v56  ;;  %v116_v58 = vsel %vm112_vm3, %v110_v55, 0.0 }
  0xd3   :  { %v119_v61 = vsel %vm118_vm4, %v116_v58, 0.0 }
  0xd4   :  { %v111_v59 = vmax.f32 %v109_v57, 0.0 }
  0xd6   :  { %v117_v60 = vsel %vm353_vm7, %v111_v59, 0.0 }
  0xd7   :  { %v120_v62 = vsel %vm118_vm4, %v117_v60, 0.0 }
  0xd8   :  { %v121_v63 = vadd.f32 %v120_v62, %v119_v61 }
  0xda   :  { %v122_v0 = vrot.slane %v121_v63, 4 }
  0xdc   :  { %v123_v1 = vadd.f32 %v122_v0, %v121_v63 }
  0xde   :  { %v124_v2 = vrot.slane %v123_v1, 2 }
  0xe0   :  { %v125_v3 = vadd.f32 %v124_v2, %v123_v1 }
  0xe2   :  { %v126_v4 = vrot.slane %v125_v3, 1 }
  0xe4   :  { %v127_v6 = vadd.f32 %v126_v4, %v125_v3 }
  0xe6   :  { %v142_v7 = vadd.f32 %v141_v5, %v127_v6 }
  0xe8   :  { %144 = vst.msk [vmem:[#allocation8] sm:$0x1] %vm36_vm0, %v142_v7 }
  0xe9   :  { %259 = shalt.err (!%p256_p6)
}
  0xea   :  { %157 = dma.vmem_to_hbm [thread:$0]  %s155_s26, 16, %s376_s5, [#allocation9]  }
  0xeb   :  { %274 = dma.done.wait [#allocation9], 16  }
  0xec   :  { %275 = vsyncadd [#allocation9], 4294967280 }
  0xed   :  { %276 = dma.done.wait [#allocation11], 16  }
  0xee   :  { %277 = vsyncadd [#allocation11], 4294967280 }
  0xef   :  { %174 = vsyncpa [#allocation9], 1 }
  0xf0   :  { %175 = vsyncpa [#allocation11], 1 }

</bundles_post_ra>
